<compile_context>
chip_gen: v7x
topology: tpu7x:2x2x1
jax: 0.10.0
libtpu: 0.0.40
codegen_flags: <defaults>
</compile_context>

<pallas_src>
import functools
import math

import jax
import jax.numpy as jnp
from jax.experimental import pallas as pl
from jax.experimental.pallas import tpu as pltpu

# ---- "module config" (mirrors FactorizedColorization.__init__) --------------
INVERSE_COLOR = False
GUIDANCE_SCALE = 10.0
NUM_INFERENCE_STEPS = 30      # one representative step realized in-kernel
NOISE_LEVEL = 50
# deterministic scheduler constants for the representative DDPM-style step
ALPHA_T = 0.85
SIGMA_T = math.sqrt(1.0 - ALPHA_T * ALPHA_T)
HALF_INV_ALPHA = 0.5 / ALPHA_T

# fused constants:  out = y - mean_c(y) + gray,
# y = C_X * x_t + C_U * eps_u2 + C_T * eps_t2
C_X = HALF_INV_ALPHA
C_U = HALF_INV_ALPHA * SIGMA_T * (GUIDANCE_SCALE - 1.0)
C_T = -HALF_INV_ALPHA * SIGMA_T * GUIDANCE_SCALE

LANES = 128          # lane width of a vreg
SUBLANE_PACK = 16    # bf16 packs 16 rows per vreg -> tile rows in multiples of 16


def _factorized_step_kernel(gray_ref, xt_ref, eu_ref, et_ref, out_ref, *,
                            inverse_color):
    """out = y - mean_c(y) + gray,  y = C_X*x_t + C_U*e_u + C_T*e_t.

    Constant-folded form of:
        g'       = ((1-gray) if inverse else gray) * 2 - 1
        eps_i    = eps_u + G * (eps_t - eps_u)                 (per view)
        eps_comb = L(eps_1) + AB(eps_2)
        x0       = (x_t - SIGMA_T * eps_comb) / ALPHA_T
        x0       = x0 - mean_c(x0) + g'                        (luminance clamp)
        out      = x0 * 0.5 + 0.5
    The L(eps_1) term cancels exactly; mean_c is linear and mean_c(AB)=0, so
    both channel-mean subtractions fold into the single mean of y; 0.5*g'+0.5
    folds back to the raw (possibly inverted) gray image.
    """
    # upcast bf16 -> f32 immediately after load (v5e VPU has no bf16 ALU;
    # f32 also keeps the 10x guidance amplification within tolerance).
    g = gray_ref[...].astype(jnp.float32)             # (1, tr, 128)
    if inverse_color:
        g = 1.0 - g

    y = (C_X * xt_ref[...].astype(jnp.float32)
         + C_U * eu_ref[...].astype(jnp.float32)
         + C_T * et_ref[...].astype(jnp.float32))     # (3, tr, 128)

    # channel mean over 3 planes: pure VPU (2 adds + 1 scale), no XLU
    out = y - jnp.mean(y, axis=0, keepdims=True) + g  # g broadcasts over channels
    out_ref[...] = out.astype(out_ref.dtype)


def _round_up(x, m):
    return -(-x // m) * m


def _tpu_generation_params():
    """(vmem_capacity_bytes, num_tensorcores) with conservative fallbacks."""
    vmem_cap = 128 << 20
    num_tc = 1
    try:
        info = pltpu.get_tpu_info()
        vmem_cap = int(getattr(info, "vmem_capacity_bytes", vmem_cap))
    except Exception:
        pass
    try:
        kind = jax.devices()[0].device_kind.lower()
        if "v7" in kind or "7x" in kind:
            num_tc = 2
            vmem_cap = min(vmem_cap, 64 << 20)   # v7x: 64 MiB per TC
    except Exception:
        pass
    return vmem_cap, num_tc


def _choose_tiling(n_rows, n_planes, dtype_bytes, vmem_capacity_bytes, num_tc):
    """Pick (tile_rows, steps); tile_rows is a multiple of 16 and need NOT
    divide n_rows (the wrapper pads rows up to tile_rows*steps).

    1-TC chips (v5e/v6e): single biggest tile that fits the budget (grid steps
    are pure ~0.35us overhead).  2-TC chips (v7x): even step count so both
    TensorCores get equal work, and a tighter budget against 64 MiB VMEM.
    """
    budget = max(1 << 20, vmem_capacity_bytes // 4)          # 16 MiB on v7x, 32 MiB v5e/v6e
    bytes_per_row = 2 * n_planes * LANES * dtype_bytes       # x2: double-buffered pipeline
    rows_budget = max(SUBLANE_PACK,
                      (budget // bytes_per_row) // SUBLANE_PACK * SUBLANE_PACK)
    steps = max(1, -(-n_rows // rows_budget))
    if num_tc == 2:
        if steps == 1 and n_rows > SUBLANE_PACK:
            steps = 2                                        # give both cores work
        elif steps > 1 and steps % 2 == 1:
            steps += 1                                       # even split across 2 TCs
    tile_rows = _round_up(max(1, -(-n_rows // steps)), SUBLANE_PACK)
    return tile_rows, steps


def factorized_colorization_step(gray_im, x_t, eps_u1=None, eps_t1=None,
                                 eps_u2=None, eps_t2=None,
                                 inverse_color=INVERSE_COLOR):
    """gray_im: (1, H, W); x_t / eps_*: (3, H, W). Returns (3, H, W) image.

    eps_u1 / eps_t1 (the L-view predictions) are accepted for API parity with
    the module's per-step data but are never read: the luminance clamp makes
    them algebraically irrelevant to the output.
    """
    del eps_u1, eps_t1  # dead inputs — see kernel docstring
    _, H, W = gray_im.shape
    out_dtype = x_t.dtype
    dtype_bytes = jnp.dtype(out_dtype).itemsize

    # Fold rows into lanes: contiguous row-major reshape (C,H,W) -> (C,R,128).
    # No W padding -> no wasted HBM bandwidth when W is not a multiple of 128.
    n = H * W
    n_rows = -(-n // LANES)

    vmem_cap, num_tc = _tpu_generation_params()
    n_planes = 1 + 3 + 3 + 3 + 3                     # inputs + output
    tile_rows, steps = _choose_tiling(n_rows, n_planes, dtype_bytes,
                                      vmem_cap, num_tc)
    rows_padded = tile_rows * steps
    n_padded = rows_padded * LANES

    def to_lane_dense(a, c):
        a = a.reshape(c, n)
        if n_padded != n:
            a = jnp.pad(a, ((0, 0), (0, n_padded - n)))
        return a.reshape(c, rows_padded, LANES)

    gray_l = to_lane_dense(gray_im, 1)
    xt_l = to_lane_dense(x_t, 3)
    eu_l = to_lane_dense(eps_u2, 3)
    et_l = to_lane_dense(eps_t2, 3)

    spec1 = pl.BlockSpec((1, tile_rows, LANES), lambda i: (0, i, 0))
    spec3 = pl.BlockSpec((3, tile_rows, LANES), lambda i: (0, i, 0))

    cost = pl.CostEstimate(
        flops=10 * 3 * n_padded,                     # a handful of VPU ops / pixel
        transcendentals=0,
        bytes_accessed=n_planes * n_padded * dtype_bytes)

    out = pl.pallas_call(
        functools.partial(_factorized_step_kernel, inverse_color=inverse_color),
        out_shape=jax.ShapeDtypeStruct((3, rows_padded, LANES), out_dtype),
        grid=(steps,),
        in_specs=[spec1, spec3, spec3, spec3],
        out_specs=spec3,
        compiler_params=pltpu.CompilerParams(
            dimension_semantics=("parallel",),
            vmem_limit_bytes=min(vmem_cap // 2, 64 << 20),  # 32 MiB on v7x
        ),
        cost_estimate=cost,
    )(gray_l, xt_l, eu_l, et_l)

    out = out.reshape(3, n_padded)
    if n_padded != n:
        out = out[:, :n]
    return out.reshape(3, H, W)


def _reference(gray_im, x_t, eps_u1, eps_t1, eps_u2, eps_t2,
               inverse_color=INVERSE_COLOR):
    """Full, un-cancelled reference math (f32), matching the PyTorch module."""
    f32 = lambda a: a.astype(jnp.float32)
    g = f32(gray_im)
    if inverse_color:
        g = 1.0 - g
    g = g * 2.0 - 1.0
    eps1 = f32(eps_u1) + GUIDANCE_SCALE * (f32(eps_t1) - f32(eps_u1))
    eps2 = f32(eps_u2) + GUIDANCE_SCALE * (f32(eps_t2) - f32(eps_u2))
    l1 = jnp.mean(eps1, axis=0, keepdims=True)
    ab2 = eps2 - jnp.mean(eps2, axis=0, keepdims=True)
    eps_comb = l1 + ab2
    x0 = (f32(x_t) - SIGMA_T * eps_comb) / ALPHA_T
    x0 = x0 - jnp.mean(x0, axis=0, keepdims=True) + g
    return x0 * 0.5 + 0.5


def _run_case(key, H, W, dt, inverse_color):
    ks = jax.random.split(key, 6)
    gray_im = jax.random.uniform(ks[0], (1, H, W), jnp.float32).astype(dt)
    x_t     = jax.random.normal(ks[1], (3, H, W), jnp.float32).astype(dt)
    # stand-ins for the (uncond, text) UNet noise predictions of the two views
    eps_u1  = jax.random.normal(ks[2], (3, H, W), jnp.float32).astype(dt)
    eps_t1  = jax.random.normal(ks[3], (3, H, W), jnp.float32).astype(dt)
    eps_u2  = jax.random.normal(ks[4], (3, H, W), jnp.float32).astype(dt)
    eps_t2  = jax.random.normal(ks[5], (3, H, W), jnp.float32).astype(dt)

    out = factorized_colorization_step(gray_im, x_t, eps_u1, eps_t1,
                                       eps_u2, eps_t2,
                                       inverse_color=inverse_color)
    out = jax.block_until_ready(out)

    ref = _reference(gray_im, x_t, eps_u1, eps_t1, eps_u2, eps_t2,
                     inverse_color=inverse_color)
    assert out.shape == (3, H, W)
    assert out.dtype == dt
    err = float(jnp.max(jnp.abs(out.astype(jnp.float32) - ref)))
    assert jnp.allclose(out.astype(jnp.float32), ref, rtol=1e-2, atol=2e-2), err


if __name__ == "__main__":
    key = jax.random.PRNGKey(0)
    dt = jnp.bfloat16                  # HBM boundary dtype (UNets run fp16/bf16)
    keys = jax.random.split(key, 3)

    # DeepFloyd IF stage-1 resolution, both inverse_color branches
    _run_case(keys[0], 64, 64, dt, inverse_color=False)
    _run_case(keys[1], 64, 64, dt, inverse_color=True)
    # awkward (non-128-multiple) spatial size exercises the pad/slice path
    _run_case(keys[2], 40, 56, dt, inverse_color=False)

    print("KERNEL_OK")
</pallas_src>

<mosaic_0001>
module attributes {stable_mosaic.version = 11 : i64} {
  func.func @_factorized_step_kernel(%arg0: i32, %arg1: memref<1x32x128xbf16, #tpu.memory_space<vmem>>, %arg2: memref<3x32x128xbf16, #tpu.memory_space<vmem>>, %arg3: memref<3x32x128xbf16, #tpu.memory_space<vmem>>, %arg4: memref<3x32x128xbf16, #tpu.memory_space<vmem>>, %arg5: memref<3x32x128xbf16, #tpu.memory_space<vmem>>) attributes {dimension_semantics = [#tpu.dimension_semantics<parallel>], iteration_bounds = array<i64: 1>, scalar_prefetch = 0 : i64, scratch_operands = 0 : i64, tpu.core_type = #tpu.core_type<tc>, window_params = [{transform_indices = @transform_0, window_bounds = array<i64: 1, 32, 128>}, {transform_indices = @transform_1, window_bounds = array<i64: 3, 32, 128>}, {transform_indices = @transform_2, window_bounds = array<i64: 3, 32, 128>}, {transform_indices = @transform_3, window_bounds = array<i64: 3, 32, 128>}, {transform_indices = @transform_4, window_bounds = array<i64: 3, 32, 128>}]} {
    %c0 = arith.constant 0 : index
    %c0_0 = arith.constant 0 : index
    %c0_1 = arith.constant 0 : index
    %0 = vector.load %arg1[%c0, %c0_0, %c0_1] : memref<1x32x128xbf16, #tpu.memory_space<vmem>>, vector<1x32x128xbf16>
    %1 = arith.extf %0 : vector<1x32x128xbf16> to vector<1x32x128xf32>
    %c0_2 = arith.constant 0 : index
    %c0_3 = arith.constant 0 : index
    %c0_4 = arith.constant 0 : index
    %2 = vector.load %arg2[%c0_2, %c0_3, %c0_4] : memref<3x32x128xbf16, #tpu.memory_space<vmem>>, vector<3x32x128xbf16>
    %3 = arith.extf %2 : vector<3x32x128xbf16> to vector<3x32x128xf32>
    %cst = arith.constant 0.588235319 : f32
    %4 = vector.broadcast %cst : f32 to vector<3x32x128xf32>
    %5 = arith.mulf %4, %3 : vector<3x32x128xf32>
    %c0_5 = arith.constant 0 : index
    %c0_6 = arith.constant 0 : index
    %c0_7 = arith.constant 0 : index
    %6 = vector.load %arg3[%c0_5, %c0_6, %c0_7] : memref<3x32x128xbf16, #tpu.memory_space<vmem>>, vector<3x32x128xbf16>
    %7 = arith.extf %6 : vector<3x32x128xbf16> to vector<3x32x128xf32>
    %cst_8 = arith.constant 2.78884959 : f32
    %8 = vector.broadcast %cst_8 : f32 to vector<3x32x128xf32>
    %9 = arith.mulf %8, %7 : vector<3x32x128xf32>
    %10 = arith.addf %5, %9 : vector<3x32x128xf32>
    %c0_9 = arith.constant 0 : index
    %c0_10 = arith.constant 0 : index
    %c0_11 = arith.constant 0 : index
    %11 = vector.load %arg4[%c0_9, %c0_10, %c0_11] : memref<3x32x128xbf16, #tpu.memory_space<vmem>>, vector<3x32x128xbf16>
    %12 = arith.extf %11 : vector<3x32x128xbf16> to vector<3x32x128xf32>
    %cst_12 = arith.constant -3.09872174 : f32
    %13 = vector.broadcast %cst_12 : f32 to vector<3x32x128xf32>
    %14 = arith.mulf %13, %12 : vector<3x32x128xf32>
    %15 = arith.addf %10, %14 : vector<3x32x128xf32>
    %cst_13 = arith.constant dense<0.000000e+00> : vector<32x128xf32>
    %16 = vector.multi_reduction <add>, %15, %cst_13 [0] : vector<3x32x128xf32> to vector<32x128xf32>
    %17 = vector.shape_cast %16 : vector<32x128xf32> to vector<1x32x128xf32>
    %cst_14 = arith.constant 3.000000e+00 : f32
    %18 = vector.broadcast %cst_14 : f32 to vector<1x32x128xf32>
    %19 = arith.divf %17, %18 : vector<1x32x128xf32>
    %20 = vector.broadcast %19 : vector<1x32x128xf32> to vector<3x32x128xf32>
    %21 = arith.subf %15, %20 : vector<3x32x128xf32>
    %22 = vector.broadcast %1 : vector<1x32x128xf32> to vector<3x32x128xf32>
    %23 = arith.addf %21, %22 : vector<3x32x128xf32>
    %24 = arith.truncf %23 : vector<3x32x128xf32> to vector<3x32x128xbf16>
    %c0_15 = arith.constant 0 : index
    %c0_16 = arith.constant 0 : index
    %c0_17 = arith.constant 0 : index
    %25 = vector.load %arg5[%c0_15, %c0_16, %c0_17] : memref<3x32x128xbf16, #tpu.memory_space<vmem>>, vector<3x32x128xbf16>
    tpu.vector_store %arg5[%c0_15, %c0_16, %c0_17], %24 {strides = array<i32>} : memref<3x32x128xbf16, #tpu.memory_space<vmem>>, vector<3x32x128xbf16>,
    return
  }
  func.func @transform_0(%arg0: i32) -> (i32, i32, i32) {
    %c0_i32 = arith.constant 0 : i32
    %c0_i32_0 = arith.constant 0 : i32
    %c0_i32_1 = arith.constant 0 : i32
    return %c0_i32, %arg0, %c0_i32_0 : i32, i32, i32
  }
  func.func @transform_1(%arg0: i32) -> (i32, i32, i32) {
    %c0_i32 = arith.constant 0 : i32
    %c0_i32_0 = arith.constant 0 : i32
    %c0_i32_1 = arith.constant 0 : i32
    return %c0_i32, %arg0, %c0_i32_0 : i32, i32, i32
  }
  func.func @transform_2(%arg0: i32) -> (i32, i32, i32) {
    %c0_i32 = arith.constant 0 : i32
    %c0_i32_0 = arith.constant 0 : i32
    %c0_i32_1 = arith.constant 0 : i32
    return %c0_i32, %arg0, %c0_i32_0 : i32, i32, i32
  }
  func.func @transform_3(%arg0: i32) -> (i32, i32, i32) {
    %c0_i32 = arith.constant 0 : i32
    %c0_i32_0 = arith.constant 0 : i32
    %c0_i32_1 = arith.constant 0 : i32
    return %c0_i32, %arg0, %c0_i32_0 : i32, i32, i32
  }
  func.func @transform_4(%arg0: i32) -> (i32, i32, i32) {
    %c0_i32 = arith.constant 0 : i32
    %c0_i32_0 = arith.constant 0 : i32
    %c0_i32_1 = arith.constant 0 : i32
    return %c0_i32, %arg0, %c0_i32_0 : i32, i32, i32
  }
}

</mosaic_0001>

<bundles_post_ra>
// kernel: tpu_custom_call.1
= control target key start
LH: loop header
LB: loop body
LE: loop exit
PB: predicated region body
PF: predicated region fallthrough
CT: control target
= control target key end

     0   :  { %9 = vsyncpa [#allocation3], 0  ;;  %s756_s0 = inlined_call_operand.hbm [shape: bf16[1,32,128], index: 0, kind: input, shape index: {}]   ;;  %s757_s1 = inlined_call_operand.hbm [shape: bf16[3,32,128], index: 1, kind: input, shape index: {}]   ;;  %s758_s2 = inlined_call_operand.hbm [shape: bf16[3,32,128], index: 2, kind: input, shape index: {}]   ;;  %s759_s3 = inlined_call_operand.hbm [shape: bf16[3,32,128], index: 3, kind: input, shape index: {}]   ;;  %s760_s4 = inlined_call_operand.hbm [shape: bf16[3,32,128], index: 4, kind: output, shape index: {}]  }
   0x1   :  { %10 = vsyncpa [#allocation6], 0 }
   0x2   :  { %11 = vsyncpa [#allocation9], 0 }
   0x3   :  { %12 = vsyncpa [#allocation4], 0  ;;  %s609_s15 = smov [#allocation5]   ;;  %s610_s17 = smov [#allocation2]  }
   0x4   :  { %s30_s16 = sshll.u32 %s609_s15, 4  ;;  %s18_s18 = sshll.u32 %s610_s17, 4  ;;  %s31_s16 = int_to_ptr.vmem [resolvable:$true] %s30_s16  ;;  %s641_s18 = int_to_ptr.vmem [resolvable:$true] %s18_s18 }
   0x5   :  { %s491_s21 = scalar_lea.hbm %s757_s1, 768 }
   0x6   :  { %p492_p0 = scmp.ne.s32.totalorder %s757_s1, %s491_s21  ;;  %p495_p1 = scmp.lt.u32.totalorder %s491_s21, %s757_s1 }
   0x8   :  { %p497_p2 = pnand %p495_p1, %p492_p0 }
   0xa   :  { %500 = shalt.err (!%p497_p2)
}
   0xb   :  { %s501_s26 = scalar_lea.vmem %s31_s16, 768  ;;  %p506_p4 = scmp.lt.s32.totalorder %s31_s16, %s31_s16 }
   0xc   :  { %p502_p3 = scmp.ne.s32.totalorder %s31_s16, %s501_s26  ;;  %p507_p5 = scmp.lt.s32.totalorder %s501_s26, %s501_s26 }
   0xe   :  { %p508_p6 = por %p507_p5, %p506_p4 }
  0x10   :  { %p509_p7 = pnand %p508_p6, %p502_p3 }
  0x12   :  { %512 = shalt.err (!%p509_p7)
}
  0x13   :  { %s611_s27 = smov 64   ;;  %s612_s28 = smov 4  }
  0x14   :  { %36 = dma.hbm_to_vmem [thread:$0]  %s757_s1, 768, %s31_s16, [#allocation6], %s611_s27, %s611_s27, %s612_s28  }
  0x15   :  { %s513_s7 = scalar_lea.hbm %s756_s0, 256 }
  0x16   :  { %p514_p8 = scmp.ne.s32.totalorder %s756_s0, %s513_s7  ;;  %p517_p9 = scmp.lt.u32.totalorder %s513_s7, %s756_s0 }
  0x18   :  { %p519_p10 = pnand %p517_p9, %p514_p8 }
  0x1a   :  { %522 = shalt.err (!%p519_p10)
}
  0x1b   :  { %s523_s12 = scalar_lea.vmem %s641_s18, 256  ;;  %p528_p12 = scmp.lt.s32.totalorder %s641_s18, %s641_s18 }
  0x1c   :  { %p524_p11 = scmp.ne.s32.totalorder %s641_s18, %s523_s12  ;;  %p529_p13 = scmp.lt.s32.totalorder %s523_s12, %s523_s12 }
  0x1e   :  { %p530_p0 = por %p529_p13, %p528_p12 }
  0x20   :  { %p531_p1 = pnand %p530_p0, %p524_p11 }
  0x22   :  { %534 = shalt.err (!%p531_p1)
}
  0x23   :  { %24 = dma.hbm_to_vmem [thread:$0]  %s756_s0, 256, %s641_s18, [#allocation3], %s611_s27, %s611_s27, %s612_s28  }
  0x24   :  { %s613_s14 = smov [#allocation7]   ;;  %s614_s16 = smov [#allocation8]  }
  0x25   :  { %s42_s15 = sshll.u32 %s613_s14, 4  ;;  %s54_s17 = sshll.u32 %s614_s16, 4  ;;  %s43_s15 = int_to_ptr.vmem [resolvable:$true] %s42_s15  ;;  %s678_s17 = int_to_ptr.vmem [resolvable:$true] %s54_s17 }
  0x26   :  { %s535_s21 = scalar_lea.hbm %s758_s2, 768 }
  0x27   :  { %p536_p2 = scmp.ne.s32.totalorder %s758_s2, %s535_s21  ;;  %p539_p3 = scmp.lt.u32.totalorder %s535_s21, %s758_s2 }
  0x29   :  { %p541_p4 = pnand %p539_p3, %p536_p2 }
  0x2b   :  { %544 = shalt.err (!%p541_p4)
}
  0x2c   :  { %s545_s0 = scalar_lea.vmem %s43_s15, 768  ;;  %p550_p6 = scmp.lt.s32.totalorder %s43_s15, %s43_s15 }
  0x2d   :  { %p546_p5 = scmp.ne.s32.totalorder %s43_s15, %s545_s0  ;;  %p551_p7 = scmp.lt.s32.totalorder %s545_s0, %s545_s0 }
  0x2f   :  { %p552_p8 = por %p551_p7, %p550_p6 }
  0x31   :  { %p553_p9 = pnand %p552_p8, %p546_p5 }
  0x33   :  { %556 = shalt.err (!%p553_p9)
}
  0x34   :  { %48 = dma.hbm_to_vmem [thread:$0]  %s758_s2, 768, %s43_s15, [#allocation6], %s611_s27, %s611_s27, %s612_s28  }
  0x35   :  { %s557_s5 = scalar_lea.hbm %s759_s3, 768 }
  0x36   :  { %p558_p10 = scmp.ne.s32.totalorder %s759_s3, %s557_s5  ;;  %p561_p11 = scmp.lt.u32.totalorder %s557_s5, %s759_s3 }
  0x38   :  { %p563_p12 = pnand %p561_p11, %p558_p10 }
  0x3a   :  { %566 = shalt.err (!%p563_p12)
}
  0x3b   :  { %s567_s10 = scalar_lea.vmem %s678_s17, 768  ;;  %p572_p0 = scmp.lt.s32.totalorder %s678_s17, %s678_s17 }
  0x3c   :  { %p568_p13 = scmp.ne.s32.totalorder %s678_s17, %s567_s10  ;;  %p573_p1 = scmp.lt.s32.totalorder %s567_s10, %s567_s10 }
  0x3e   :  { %p574_p2 = por %p573_p1, %p572_p0 }
  0x40   :  { %p575_p3 = pnand %p574_p2, %p568_p13 }
  0x42   :  { %578 = shalt.err (!%p575_p3)
}
  0x43   :  { %60 = dma.hbm_to_vmem [thread:$0]  %s759_s3, 768, %s678_s17, [#allocation9], %s611_s27, %s611_s27, %s612_s28  }
  0x44   :  { %601 = dma.done.wait [#allocation3], 256  }
  0x45   :  { %602 = vsyncadd [#allocation3], 4294967040 }
  0x46   :  { %603 = dma.done.wait [#allocation6], 1536  }
  0x47   :  { %604 = vsyncadd [#allocation6], 4294965760 }
  0x48   :  { %605 = dma.done.wait [#allocation9], 768  }
  0x49   :  { %606 = vsyncadd [#allocation9], 4294966528  ;;  %v362_v0 = vld [vmem:[#allocation5] sm:$0xff]   ;;  %v465_v1 = vld [vmem:[#allocation5 + $0x10] sm:$0xff]   ;;  %s615_s3 = smov [#allocation10]  }
  0x4a   :  { %v363_v2 = vunpack.c.l.bf16 %v362_v0  ;;  %v364_v3 = vunpack.c.h.bf16 %v362_v0  ;;  %v467_v4 = vld [vmem:[#allocation5 + $0x20] sm:$0xff]   ;;  %v386_v5 = vld [vmem:[#allocation7] sm:$0xff]   ;;  %v371_v7 = vunpack.c.l.bf16 %v465_v1  ;;  %v372_v8 = vunpack.c.h.bf16 %v465_v1  ;;  %v464_v48 = vld [vmem:[#allocation5 + $0x8] sm:$0xff]   ;;  %s315_s12 = sshll.u32 %s615_s3, 4  ;;  %s316_s12 = int_to_ptr.vmem [resolvable:$true] %s315_s12 }
  0x4b   :  { %v470_v6 = vld [vmem:[#allocation7 + $0x10] sm:$0xff]   ;;  %v379_v9 = vunpack.c.l.bf16 %v467_v4  ;;  %v380_v10 = vunpack.c.h.bf16 %v467_v4  ;;  %v472_v11 = vld [vmem:[#allocation7 + $0x20] sm:$0xff]   ;;  %v387_v14 = vunpack.c.l.bf16 %v386_v5  ;;  %v388_v15 = vunpack.c.h.bf16 %v386_v5  ;;  %v466_v53 = vld [vmem:[#allocation5 + $0x18] sm:$0xff]   ;;  %s579_s1 = scalar_lea.vmem %s316_s12, 768  ;;  %p584_p5 = scmp.lt.s32.totalorder %s316_s12, %s316_s12 }
  0x4c   :  { %v105_v12 = vmul.f32 0.5882353, %v363_v2  ;;  %v106_v13 = vmul.f32 0.5882353, %v364_v3  ;;  %v410_v16 = vld [vmem:[#allocation8] sm:$0xff]   ;;  %v395_v20 = vunpack.c.l.bf16 %v470_v6  ;;  %v396_v22 = vunpack.c.h.bf16 %v470_v6  ;;  %v475_v25 = vld [vmem:[#allocation8 + $0x10] sm:$0xff]   ;;  %p580_p4 = scmp.ne.s32.totalorder %s316_s12, %s579_s1  ;;  %p585_p6 = scmp.lt.s32.totalorder %s579_s1, %s579_s1 }
  0x4d   :  { %v109_v17 = vmul.f32 0.5882353, %v371_v7  ;;  %v110_v18 = vmul.f32 0.5882353, %v372_v8  ;;  %v113_v19 = vmul.f32 0.5882353, %v379_v9  ;;  %v403_v23 = vunpack.c.l.bf16 %v472_v11 }
  0x4e   :  { %v114_v21 = vmul.f32 0.5882353, %v380_v10  ;;  %v404_v24 = vunpack.c.h.bf16 %v472_v11  ;;  %v477_v26 = vld [vmem:[#allocation8 + $0x20] sm:$0xff]   ;;  %v141_v27 = vmul.f32 2.7888496, %v387_v14  ;;  %v411_v30 = vunpack.c.l.bf16 %v410_v16  ;;  %v354_v35 = vld [vmem:[#allocation2] sm:$0xff]   ;;  %p586_p7 = por %p585_p6, %p584_p5 }
  0x4f   :  { %v142_v28 = vmul.f32 2.7888496, %v388_v15  ;;  %v145_v29 = vmul.f32 2.7888496, %v395_v20  ;;  %v146_v31 = vmul.f32 2.7888496, %v396_v22  ;;  %v412_v34 = vunpack.c.h.bf16 %v410_v16 }
  0x50   :  { %v149_v32 = vmul.f32 2.7888496, %v403_v23  ;;  %v150_v33 = vmul.f32 2.7888496, %v404_v24  ;;  %v153_v36 = vadd.f32 %v141_v27, %v105_v12  ;;  %v419_v39 = vunpack.c.l.bf16 %v475_v25  ;;  %v468_v58 = vld [vmem:[#allocation5 + $0x28] sm:$0xff]   ;;  %v469_v63 = vld [vmem:[#allocation7 + $0x8] sm:$0xff]   ;;  %p587_p8 = pnand %p586_p7, %p580_p4 }
  0x51   :  { %v154_v37 = vadd.f32 %v142_v28, %v106_v13  ;;  %v157_v38 = vadd.f32 %v145_v29, %v109_v17  ;;  %v158_v40 = vadd.f32 %v146_v31, %v110_v18  ;;  %v420_v43 = vunpack.c.h.bf16 %v475_v25  ;;  %v471_v8 = vld [vmem:[#allocation7 + $0x18] sm:$0xff]   ;;  %v473_v9 = vld [vmem:[#allocation7 + $0x28] sm:$0xff]  }
  0x52   :  { %v161_v41 = vadd.f32 %v149_v32, %v113_v19  ;;  %v162_v42 = vadd.f32 %v150_v33, %v114_v21  ;;  %v427_v44 = vunpack.c.l.bf16 %v477_v26  ;;  %v428_v45 = vunpack.c.h.bf16 %v477_v26  ;;  %v474_v18 = vld [vmem:[#allocation8 + $0x8] sm:$0xff]  }
  0x53   :  { %v189_v46 = vmul.f32 -3.0987217, %v411_v30  ;;  %v190_v47 = vmul.f32 -3.0987217, %v412_v34  ;;  %v715_v49 = vunpack.c.l.bf16 %v354_v35  ;;  %v717_v50 = vunpack.c.h.bf16 %v354_v35  ;;  %v476_v35 = vld [vmem:[#allocation8 + $0x18] sm:$0xff]  }
  0x54   :  { %v193_v51 = vmul.f32 -3.0987217, %v419_v39  ;;  %v194_v52 = vmul.f32 -3.0987217, %v420_v43  ;;  %v197_v54 = vmul.f32 -3.0987217, %v427_v44  ;;  %v367_v61 = vunpack.c.l.bf16 %v464_v48 }
  0x55   :  { %v198_v55 = vmul.f32 -3.0987217, %v428_v45  ;;  %v201_v56 = vadd.f32 %v189_v46, %v153_v36  ;;  %v202_v57 = vadd.f32 %v190_v47, %v154_v37  ;;  %v368_v62 = vunpack.c.h.bf16 %v464_v48 }
  0x56   :  { %v719_v59 = vadd.f32 %v193_v51, %v157_v38  ;;  %v721_v60 = vadd.f32 %v194_v52, %v158_v40  ;;  %v723_v0 = vadd.f32 %v197_v54, %v161_v41  ;;  %v375_v2 = vunpack.c.l.bf16 %v466_v53  ;;  %v478_v40 = vld [vmem:[#allocation8 + $0x28] sm:$0xff]  }
  0x57   :  { %v725_v1 = vadd.f32 %v198_v55, %v162_v42  ;;  %v376_v3 = vunpack.c.h.bf16 %v466_v53  ;;  %v383_v6 = vunpack.c.l.bf16 %v468_v58  ;;  %v384_v7 = vunpack.c.h.bf16 %v468_v58 }
  0x58   :  { %v213_v4 = vadd.f32 %v719_v59, %v201_v56  ;;  %v215_v5 = vadd.f32 %v721_v60, %v202_v57  ;;  %v107_v10 = vmul.f32 0.5882353, %v367_v61  ;;  %v108_v11 = vmul.f32 0.5882353, %v368_v62 }
  0x59   :  { %v111_v12 = vmul.f32 0.5882353, %v375_v2  ;;  %v391_v13 = vunpack.c.l.bf16 %v469_v63  ;;  %v112_v16 = vmul.f32 0.5882353, %v376_v3  ;;  %v115_v17 = vmul.f32 0.5882353, %v383_v6 }
  0x5a   :  { %v214_v14 = vadd.f32 %v213_v4, %v723_v0  ;;  %v216_v15 = vadd.f32 %v215_v5, %v725_v1  ;;  %v116_v19 = vmul.f32 0.5882353, %v384_v7  ;;  %v392_v20 = vunpack.c.h.bf16 %v469_v63 }
  0x5b   :  { %v399_v21 = vunpack.c.l.bf16 %v471_v8  ;;  %v400_v22 = vunpack.c.h.bf16 %v471_v8  ;;  %v407_v25 = vunpack.c.l.bf16 %v473_v9  ;;  %v408_v26 = vunpack.c.h.bf16 %v473_v9 }
  0x5c   :  { %v222_v23 = vmul.f32 0.33333334, %v214_v14  ;;  %v223_v24 = vmul.f32 0.33333334, %v216_v15  ;;  %v143_v27 = vmul.f32 2.7888496, %v391_v13  ;;  %v415_v30 = vunpack.c.l.bf16 %v474_v18 }
  0x5d   :  { %v144_v28 = vmul.f32 2.7888496, %v392_v20  ;;  %v147_v29 = vmul.f32 2.7888496, %v399_v21  ;;  %v148_v33 = vmul.f32 2.7888496, %v400_v22  ;;  %v416_v46 = vunpack.c.h.bf16 %v474_v18 }
  0x5e   :  { %v226_v31 = vsub.f32 %v201_v56, %v222_v23  ;;  %v227_v32 = vsub.f32 %v202_v57, %v223_v24  ;;  %v151_v34 = vmul.f32 2.7888496, %v407_v25  ;;  %v152_v36 = vmul.f32 2.7888496, %v408_v26 }
  0x5f   :  { %v155_v37 = vadd.f32 %v143_v27, %v107_v10  ;;  %v156_v38 = vadd.f32 %v144_v28, %v108_v11  ;;  %v159_v39 = vadd.f32 %v147_v29, %v111_v12  ;;  %v160_v43 = vadd.f32 %v148_v33, %v112_v16  ;;  %v463_v11 = vld [vmem:[#allocation2 + $0x8] sm:$0xff]  }
  0x60   :  { %v238_v41 = vadd.f32 %v715_v49, %v226_v31  ;;  %v239_v42 = vadd.f32 %v717_v50, %v227_v32  ;;  %v163_v44 = vadd.f32 %v151_v34, %v115_v17  ;;  %v164_v45 = vadd.f32 %v152_v36, %v116_v19 }
  0x61   :  { %v423_v47 = vunpack.c.l.bf16 %v476_v35  ;;  %v424_v48 = vunpack.c.h.bf16 %v476_v35  ;;  %v431_v52 = vunpack.c.l.bf16 %v478_v40  ;;  %v432_v53 = vunpack.c.h.bf16 %v478_v40 }
  0x62   :  { %v436_v51 = vpack.c.bf16 %v239_v42, %v238_v41  ;;  %v191_v54 = vmul.f32 -3.0987217, %v415_v30  ;;  %v192_v55 = vmul.f32 -3.0987217, %v416_v46  ;;  %v230_v58 = vsub.f32 %v719_v59, %v222_v23 }
  0x63   :  { %v195_v56 = vmul.f32 -3.0987217, %v423_v47  ;;  %v196_v57 = vmul.f32 -3.0987217, %v424_v48  ;;  %v199_v61 = vmul.f32 -3.0987217, %v431_v52  ;;  %v231_v2 = vsub.f32 %v721_v60, %v223_v24 }
  0x64   :  { %437 = vst [vmem:[#allocation10] sm:$0xff] %v436_v51   ;;  %v200_v62 = vmul.f32 -3.0987217, %v432_v53  ;;  %v203_v63 = vadd.f32 %v191_v54, %v155_v37  ;;  %v204_v3 = vadd.f32 %v192_v55, %v156_v38  ;;  %v242_v6 = vadd.f32 %v715_v49, %v230_v58 }
  0x65   :  { %v207_v4 = vadd.f32 %v195_v56, %v159_v39  ;;  %v208_v5 = vadd.f32 %v196_v57, %v160_v43  ;;  %v211_v7 = vadd.f32 %v199_v61, %v163_v44  ;;  %v243_v9 = vadd.f32 %v717_v50, %v231_v2 }
  0x66   :  { %v212_v8 = vadd.f32 %v200_v62, %v164_v45  ;;  %v234_v10 = vsub.f32 %v723_v0, %v222_v23  ;;  %v235_v13 = vsub.f32 %v725_v1, %v223_v24  ;;  %v359_v18 = vunpack.c.l.bf16 %v463_v11 }
  0x67   :  { %v217_v12 = vadd.f32 %v207_v4, %v203_v63  ;;  %v219_v59 = vadd.f32 %v208_v5, %v204_v3  ;;  %v446_v14 = vpack.c.bf16 %v243_v9, %v242_v6  ;;  %v360_v19 = vunpack.c.h.bf16 %v463_v11 }
  0x68   :  { %v246_v15 = vadd.f32 %v715_v49, %v234_v10  ;;  %v247_v17 = vadd.f32 %v717_v50, %v235_v13 }
  0x69   :  { %v218_v60 = vadd.f32 %v217_v12, %v211_v7  ;;  %v220_v16 = vadd.f32 %v219_v59, %v212_v8  ;;  %480 = vst [vmem:[#allocation10 + $0x10] sm:$0xff] %v446_v14  }
  0x6a   :  { %v456_v22 = vpack.c.bf16 %v247_v17, %v246_v15 }
  0x6b   :  { %v224_v20 = vmul.f32 0.33333334, %v218_v60  ;;  %v225_v21 = vmul.f32 0.33333334, %v220_v16 }
  0x6c   :  { %482 = vst [vmem:[#allocation10 + $0x20] sm:$0xff] %v456_v22  }
  0x6d   :  { %v228_v25 = vsub.f32 %v203_v63, %v224_v20  ;;  %v229_v0 = vsub.f32 %v204_v3, %v225_v21  ;;  %v232_v23 = vsub.f32 %v207_v4, %v224_v20  ;;  %v233_v26 = vsub.f32 %v208_v5, %v225_v21 }
  0x6e   :  { %v236_v27 = vsub.f32 %v211_v7, %v224_v20  ;;  %v237_v1 = vsub.f32 %v212_v8, %v225_v21 }
  0x6f   :  { %v240_v24 = vadd.f32 %v359_v18, %v228_v25  ;;  %v241_v28 = vadd.f32 %v360_v19, %v229_v0  ;;  %v244_v49 = vadd.f32 %v359_v18, %v232_v23  ;;  %v245_v29 = vadd.f32 %v360_v19, %v233_v26 }
  0x70   :  { %v248_v50 = vadd.f32 %v359_v18, %v236_v27  ;;  %v249_v30 = vadd.f32 %v360_v19, %v237_v1 }
  0x71   :  { %v441_v31 = vpack.c.bf16 %v241_v28, %v240_v24  ;;  %v451_v32 = vpack.c.bf16 %v245_v29, %v244_v49 }
  0x72   :  { %v461_v33 = vpack.c.bf16 %v249_v30, %v248_v50 }
  0x73   :  { %479 = vst [vmem:[#allocation10 + $0x8] sm:$0xff] %v441_v31   ;;  %481 = vst [vmem:[#allocation10 + $0x18] sm:$0xff] %v451_v32  }
  0x74   :  { %483 = vst [vmem:[#allocation10 + $0x28] sm:$0xff] %v461_v33  }
  0x75   :  { %590 = shalt.err (!%p587_p8)
}
  0x76   :  { %s591_s15 = scalar_lea.hbm %s760_s4, 768 }
  0x77   :  { %p592_p9 = scmp.ne.s32.totalorder %s760_s4, %s591_s15  ;;  %p595_p10 = scmp.lt.u32.totalorder %s591_s15, %s760_s4 }
  0x79   :  { %p597_p11 = pnand %p595_p10, %p592_p9 }
  0x7b   :  { %600 = shalt.err (!%p597_p11)
}
  0x7c   :  { %321 = dma.vmem_to_hbm [thread:$0]  %s316_s12, 768, %s760_s4, [#allocation4], %s611_s27, %s611_s27, %s612_s28  }
  0x7d   :  { %607 = dma.done.wait [#allocation4], 768  }
  0x7e   :  { %608 = vsyncadd [#allocation4], 4294966528 }
  0x7f   :  { %325 = vsyncpa [#allocation3], 1 }
  0x80   :  { %326 = vsyncpa [#allocation6], 1 }
  0x81   :  { %327 = vsyncpa [#allocation9], 1 }
  0x82   :  { %328 = vsyncpa [#allocation4], 1 }

</bundles_post_ra>
